<compile_context>
chip_gen: v5e
topology: v5e:2x2
jax: 0.10.0
libtpu: 0.0.40
codegen_flags: <defaults>
</compile_context>

<pallas_src>
import jax
import jax.numpy as jnp
from jax.experimental import pallas as pl
from jax.experimental.pallas import tpu as pltpu


def _mlp_kernel(in_ref, goal_ref, w1_ref, b1_ref, w2_ref, b2_ref,
                w3_ref, b3_ref, o_ref):
    # Fused cast + lane-concat (concat(inputs, goals) along the lane axis).
    s = in_ref[...].astype(jnp.float32)                     # (TB, L)
    g = goal_ref[...].astype(jnp.float32)                   # (TB, L)
    x = jnp.concatenate((s, g), axis=-1)                     # (TB, 2L)
    h1 = jnp.dot(x, w1_ref[...], preferred_element_type=jnp.float32) + b1_ref[...]
    h1 = jnp.maximum(h1, 0.0)                                # relu
    h2 = jnp.dot(h1, w2_ref[...], preferred_element_type=jnp.float32) + b2_ref[...]
    h2 = jnp.maximum(h2, 0.0)                                # relu
    # Un-padded (B, L) output: last dim equals the full array dim -> legal block;
    # masked store is cheaper than 16x padded HBM writeback for this kernel.
    o_ref[...] = jnp.dot(h2, w3_ref[...], preferred_element_type=jnp.float32) + b3_ref[...]


def bitflip_agent_forward(inputs, goals, params, *,
                          tile_b=2048, min_parallel_batch=512):
    """Forward pass.  inputs/goals: (B, bit_length), any numeric dtype (e.g. int8).

    tile_b is a sweep parameter (1024-4096 are all fine; VMEM is never the
    constraint at this model size).  For B >= min_parallel_batch the batch is
    split into >= 2 "parallel" grid steps so v7x's two TensorCores both get work.
    """
    w1, b1 = params["w1"], params["b1"]
    w2, b2 = params["w2"], params["b2"]
    w3, b3 = params["w3"], params["b3"]

    B, L = inputs.shape
    args = (inputs, goals, w1, b1, w2, b2, w3, b3)
    out_shape = jax.ShapeDtypeStruct((B, L), jnp.float32)

    if B < min_parallel_batch:
        # Tiny batch: a single VMEM-resident invocation, no grid / pipeline
        # bookkeeping.  Explicit VMEM memory space removes lowering ambiguity.
        vmem = pl.BlockSpec(memory_space=pltpu.MemorySpace.VMEM)
        return pl.pallas_call(
            _mlp_kernel,
            out_shape=out_shape,
            in_specs=[vmem] * len(args),
            out_specs=vmem,
        )(*args)

    # Batched path: big tiles (amortize ~0.35us/step fixed cost) but always
    # at least 2 grid iterations (v7x 2-TC sharding + pipeline overlap).
    tb = min(tile_b, ((pl.cdiv(B, 2) + 7) // 8) * 8)
    grid = (pl.cdiv(B, tb),)
    resident = lambda a: pl.BlockSpec(a.shape, lambda i: (0,) * a.ndim)
    return pl.pallas_call(
        _mlp_kernel,
        out_shape=out_shape,
        grid=grid,
        in_specs=[
            pl.BlockSpec((tb, L), lambda i: (i, 0)),   # inputs (batch-tiled)
            pl.BlockSpec((tb, L), lambda i: (i, 0)),   # goals  (batch-tiled)
            resident(w1), resident(b1),
            resident(w2), resident(b2),
            resident(w3), resident(b3),
        ],
        out_specs=pl.BlockSpec((tb, L), lambda i: (i, 0)),
        compiler_params=pltpu.CompilerParams(
            # Independent batch tiles -> shard across TensorCores (v7x megacore).
            dimension_semantics=("parallel",),
        ),
    )(*args)


def init_params(key, hidden_size, bit_length):
    """nn.Linear-style init, stored as (in, out) weights and (1, out) biases."""
    in1, out1 = bit_length * 2, hidden_size
    in2, out2 = hidden_size, hidden_size // 2
    in3, out3 = hidden_size // 2, bit_length
    ks = jax.random.split(key, 6)

    def lin(kw, kb, fan_in, fan_out):
        bound = 1.0 / jnp.sqrt(fan_in)
        w = jax.random.uniform(kw, (fan_in, fan_out), jnp.float32, -bound, bound)
        b = jax.random.uniform(kb, (1, fan_out), jnp.float32, -bound, bound)
        return w, b

    w1, b1 = lin(ks[0], ks[1], in1, out1)
    w2, b2 = lin(ks[2], ks[3], in2, out2)
    w3, b3 = lin(ks[4], ks[5], in3, out3)
    return {"w1": w1, "b1": b1, "w2": w2, "b2": b2, "w3": w3, "b3": b3}


def reference_forward(inputs, goals, params):
    """Pure-JAX reference matching the PyTorch module (f32 matmuls)."""
    hi = jax.lax.Precision.HIGHEST
    mm = lambda a, b: jnp.matmul(a, b, precision=hi)
    x = jnp.concatenate((inputs, goals), axis=-1).astype(jnp.float32)
    h1 = jnp.maximum(mm(x, params["w1"]) + params["b1"], 0.0)
    h2 = jnp.maximum(mm(h1, params["w2"]) + params["b2"], 0.0)
    return mm(h2, params["w3"]) + params["b3"]


if __name__ == "__main__":
    hidden_size = 32
    bit_length = 8

    key = jax.random.PRNGKey(0)
    k_in, k_goal, k_param = jax.random.split(key, 3)
    params = init_params(k_param, hidden_size, bit_length)

    fwd = jax.jit(lambda s, g: bitflip_agent_forward(s, g, params))

    def check(inputs, goals):
        out = jax.block_until_ready(fwd(inputs, goals))
        ref = reference_forward(inputs, goals, params)
        assert out.shape == ref.shape, (out.shape, ref.shape)
        err = float(jnp.max(jnp.abs(out - ref)))
        assert jnp.allclose(out, ref, atol=1e-5, rtol=1e-5), err

    # --- small single-block case (no grid, whole problem VMEM-resident) ---
    B_small = 8
    inputs = jax.random.bernoulli(k_in, 0.5, (B_small, bit_length)).astype(jnp.float32)
    goals = jax.random.bernoulli(k_goal, 0.5, (B_small, bit_length)).astype(jnp.float32)
    check(inputs, goals)

    # --- large batch, int8 bit inputs: exercises the >=2-step "parallel" grid ---
    B_big = 4096
    inputs_b = jax.random.bernoulli(k_in, 0.5, (B_big, bit_length)).astype(jnp.int8)
    goals_b = jax.random.bernoulli(k_goal, 0.5, (B_big, bit_length)).astype(jnp.int8)
    check(inputs_b, goals_b)

    # --- batch that does not divide the tile: exercises the masked partial tile ---
    B_odd = 3000
    inputs_o = jax.random.bernoulli(k_in, 0.5, (B_odd, bit_length)).astype(jnp.float32)
    goals_o = jax.random.bernoulli(k_goal, 0.5, (B_odd, bit_length)).astype(jnp.float32)
    check(inputs_o, goals_o)

    print("KERNEL_OK")
</pallas_src>

<mosaic_0001>
module attributes {stable_mosaic.version = 11 : i64} {
  func.func @_mlp_kernel(%arg0: memref<8x8xf32, #tpu.memory_space<vmem>>, %arg1: memref<8x8xf32, #tpu.memory_space<vmem>>, %arg2: memref<16x32xf32, #tpu.memory_space<vmem>>, %arg3: memref<1x32xf32, #tpu.memory_space<vmem>>, %arg4: memref<32x16xf32, #tpu.memory_space<vmem>>, %arg5: memref<1x16xf32, #tpu.memory_space<vmem>>, %arg6: memref<16x8xf32, #tpu.memory_space<vmem>>, %arg7: memref<1x8xf32, #tpu.memory_space<vmem>>, %arg8: memref<8x8xf32, #tpu.memory_space<vmem>>) attributes {dimension_semantics = [], scalar_prefetch = 0 : i64, scratch_operands = 0 : i64, tpu.core_type = #tpu.core_type<tc>} {
    %c0 = arith.constant 0 : index
    %c0_0 = arith.constant 0 : index
    %0 = vector.load %arg0[%c0, %c0_0] : memref<8x8xf32, #tpu.memory_space<vmem>>, vector<8x8xf32>
    %c0_1 = arith.constant 0 : index
    %c0_2 = arith.constant 0 : index
    %1 = vector.load %arg1[%c0_1, %c0_2] : memref<8x8xf32, #tpu.memory_space<vmem>>, vector<8x8xf32>
    %2 = tpu.concatenate %0, %1 in 1 : vector<8x8xf32>, vector<8x8xf32> -> vector<8x16xf32>
    %c0_3 = arith.constant 0 : index
    %c0_4 = arith.constant 0 : index
    %3 = vector.load %arg2[%c0_3, %c0_4] : memref<16x32xf32, #tpu.memory_space<vmem>>, vector<16x32xf32>
    %cst = arith.constant dense<0.000000e+00> : vector<8x32xf32>
    %4 = tpu.matmul %2, %3, %cst {dimension_numbers = #tpu.dot_dimension_numbers<[1], [0], [0], [1], [0, 0, 1, 1], [], []>} : vector<8x16xf32>, vector<16x32xf32>, vector<8x32xf32> -> vector<8x32xf32>
    %c0_5 = arith.constant 0 : index
    %c0_6 = arith.constant 0 : index
    %5 = vector.load %arg3[%c0_5, %c0_6] : memref<1x32xf32, #tpu.memory_space<vmem>>, vector<1x32xf32>
    %6 = vector.broadcast %5 : vector<1x32xf32> to vector<8x32xf32>
    %7 = arith.addf %4, %6 : vector<8x32xf32>
    %cst_7 = arith.constant 0.000000e+00 : f32
    %8 = vector.broadcast %cst_7 : f32 to vector<8x32xf32>
    %9 = arith.maximumf %7, %8 : vector<8x32xf32>
    %c0_8 = arith.constant 0 : index
    %c0_9 = arith.constant 0 : index
    %10 = vector.load %arg4[%c0_8, %c0_9] : memref<32x16xf32, #tpu.memory_space<vmem>>, vector<32x16xf32>
    %cst_10 = arith.constant dense<0.000000e+00> : vector<8x16xf32>
    %11 = tpu.matmul %9, %10, %cst_10 {dimension_numbers = #tpu.dot_dimension_numbers<[1], [0], [0], [1], [0, 0, 1, 1], [], []>} : vector<8x32xf32>, vector<32x16xf32>, vector<8x16xf32> -> vector<8x16xf32>
    %c0_11 = arith.constant 0 : index
    %c0_12 = arith.constant 0 : index
    %12 = vector.load %arg5[%c0_11, %c0_12] : memref<1x16xf32, #tpu.memory_space<vmem>>, vector<1x16xf32>
    %13 = vector.broadcast %12 : vector<1x16xf32> to vector<8x16xf32>
    %14 = arith.addf %11, %13 : vector<8x16xf32>
    %cst_13 = arith.constant 0.000000e+00 : f32
    %15 = vector.broadcast %cst_13 : f32 to vector<8x16xf32>
    %16 = arith.maximumf %14, %15 : vector<8x16xf32>
    %c0_14 = arith.constant 0 : index
    %c0_15 = arith.constant 0 : index
    %17 = vector.load %arg6[%c0_14, %c0_15] : memref<16x8xf32, #tpu.memory_space<vmem>>, vector<16x8xf32>
    %cst_16 = arith.constant dense<0.000000e+00> : vector<8x8xf32>
    %18 = tpu.matmul %16, %17, %cst_16 {dimension_numbers = #tpu.dot_dimension_numbers<[1], [0], [0], [1], [0, 0, 1, 1], [], []>} : vector<8x16xf32>, vector<16x8xf32>, vector<8x8xf32> -> vector<8x8xf32>
    %c0_17 = arith.constant 0 : index
    %c0_18 = arith.constant 0 : index
    %19 = vector.load %arg7[%c0_17, %c0_18] : memref<1x8xf32, #tpu.memory_space<vmem>>, vector<1x8xf32>
    %20 = vector.broadcast %19 : vector<1x8xf32> to vector<8x8xf32>
    %21 = arith.addf %18, %20 : vector<8x8xf32>
    %c0_19 = arith.constant 0 : index
    %c0_20 = arith.constant 0 : index
    %22 = vector.load %arg8[%c0_19, %c0_20] : memref<8x8xf32, #tpu.memory_space<vmem>>, vector<8x8xf32>
    tpu.vector_store %arg8[%c0_19, %c0_20], %21 {strides = array<i32>} : memref<8x8xf32, #tpu.memory_space<vmem>>, vector<8x8xf32>,
    return
  }
}

</mosaic_0001>

<bundles_post_ra>
// kernel: _lambda_.1
= control target key start
LH: loop header
LB: loop body
LE: loop exit
PB: predicated region body
PF: predicated region fallthrough
CT: control target
= control target key end

     0   :  { %13 = vsyncpa [#allocation3], 0  ;;  %s518_s0 = inlined_call_operand.hbm [shape: f32[8,8], index: 0, kind: input, shape index: {}]   ;;  %s519_s1 = inlined_call_operand.hbm [shape: f32[8,8], index: 1, kind: input, shape index: {}]   ;;  %s520_s2 = inlined_call_operand.hbm [shape: f32[16,32], index: 2, kind: input, shape index: {}]   ;;  %s521_s3 = inlined_call_operand.hbm [shape: f32[1,32], index: 3, kind: input, shape index: {}]   ;;  %s522_s4 = inlined_call_operand.hbm [shape: f32[32,16], index: 4, kind: input, shape index: {}]   ;;  %s523_s5 = inlined_call_operand.vmem [shape: f32[1,16], index: 5, kind: input, shape index: {}]   ;;  %s524_s6 = inlined_call_operand.hbm [shape: f32[16,8], index: 6, kind: input, shape index: {}]   ;;  %s525_s7 = inlined_call_operand.vmem [shape: f32[1,8], index: 7, kind: input, shape index: {}]   ;;  %s526_s8 = inlined_call_operand.hbm [shape: f32[8,8], index: 8, kind: output, shape index: {}]  }
   0x1   :  { %14 = vsyncpa [#allocation6], 0 }
   0x2   :  { %15 = vsyncpa [#allocation9], 0 }
   0x3   :  { %16 = vsyncpa [#allocation12], 0  ;;  %s34_s29 = sshll.u32 %s519_s1, 4  ;;  %s35_s29 = int_to_ptr.hbm [resolvable:$true] %s34_s29 }
   0x4   :  { %17 = vsyncpa [#allocation4], 0  ;;  %s433_s30 = smov [#allocation5]   ;;  %s58_s12 = sshll.u32 %s521_s3, 4  ;;  %s59_s12 = int_to_ptr.hbm [resolvable:$true] %s58_s12 }
   0x5   :  { %s36_s9 = sshll.u32 %s433_s30, 4  ;;  %s434_s13 = smov [#allocation8]   ;;  %s37_s9 = int_to_ptr.vmem [resolvable:$true] %s36_s9 }
   0x6   :  { %39 = dma.hbm_to_vmem [thread:$0]  %s35_s29, 128, %s37_s9, [#allocation6]  }
   0x7   :  { %s60_s14 = sshll.u32 %s434_s13, 4  ;;  %s23_s17 = sshll.u32 %s518_s0, 4  ;;  %s61_s14 = int_to_ptr.vmem [resolvable:$true] %s60_s14  ;;  %s24_s17 = int_to_ptr.hbm [resolvable:$true] %s23_s17 }
   0x8   :  { %63 = dma.hbm_to_vmem [thread:$0]  %s59_s12, 16, %s61_s14, [#allocation9]  }
   0x9   :  { %s44_s19 = sshll.u32 %s520_s2, 4  ;;  %s435_s20 = smov [#allocation2]   ;;  %s45_s19 = int_to_ptr.hbm [resolvable:$true] %s44_s19 }
   0xa   :  { %s25_s21 = sshll.u32 %s435_s20, 4  ;;  %s436_s3 = smov [#allocation7]   ;;  %s26_s21 = int_to_ptr.vmem [resolvable:$true] %s25_s21 }
   0xb   :  { %28 = dma.hbm_to_vmem [thread:$0]  %s24_s17, 128, %s26_s21, [#allocation3]  }
   0xc   :  { %s46_s22 = sshll.u32 %s436_s3, 4  ;;  %s437_s23 = smov 128   ;;  %s47_s22 = int_to_ptr.vmem [resolvable:$true] %s46_s22 }
   0xd   :  { %s438_s24 = smov 8   ;;  %s68_s26 = sshll.u32 %s522_s4, 4  ;;  %s69_s26 = int_to_ptr.hbm [resolvable:$true] %s68_s26 }
   0xe   :  { %52 = dma.hbm_to_vmem [thread:$0]  %s45_s19, 256, %s47_s22, [#allocation6], %s437_s23, %s437_s23, %s438_s24  }
   0xf   :  { %s439_s27 = smov [#allocation10]   ;;  %s83_s30 = sshll.u32 %s524_s6, 4  ;;  %s84_s30 = int_to_ptr.hbm [resolvable:$true] %s83_s30 }
  0x10   :  { %s70_s28 = sshll.u32 %s439_s27, 4  ;;  %s440_s9 = smov [#allocation11]   ;;  %s71_s28 = int_to_ptr.vmem [resolvable:$true] %s70_s28 }
  0x11   :  { %76 = dma.hbm_to_vmem [thread:$0]  %s69_s26, 512, %s71_s28, [#allocation9], %s437_s23, %s437_s23, %s438_s24  }
  0x12   :  { %s85_s10 = sshll.u32 %s440_s9, 4  ;;  %s86_s10 = int_to_ptr.vmem [resolvable:$true] %s85_s10 }
  0x13   :  { %91 = dma.hbm_to_vmem [thread:$0]  %s84_s30, 256, %s86_s10, [#allocation12], %s437_s23, %s437_s23, %s438_s24  }
  0x14   :  { %423 = dma.done.wait [#allocation3], 128  }
  0x15   :  { %424 = vsyncadd [#allocation3], 4294967168 }
  0x16   :  { %425 = dma.done.wait [#allocation6], 384  }
  0x17   :  { %426 = vsyncadd [#allocation6], 4294966912 }
  0x18   :  { %427 = dma.done.wait [#allocation9], 528  }
  0x19   :  { %428 = vsyncadd [#allocation9], 4294966768 }
  0x1a   :  { %429 = dma.done.wait [#allocation12], 256  }
  0x1b   :  { %430 = vsyncadd [#allocation12], 4294967040  ;;  %v119_v0 = vld [vmem:[#allocation5] sm:$0xff]  ;;  %v127_v1 = vld [vmem:[#allocation7 + $0x8] sm:$0xff]  ;;  %vm124_vm0 = vcmask 64512   ;;  %vm132_vm1 = vcmask 130048  }
  0x1c   :  { %121 = vrot.lane.b32.xlu0 %v119_v0, %s438_s24  ;;  %150 = vmatpush.msra.mxu0 %v127_v1  ;;  %v126_v2 = vld [vmem:[#allocation7] sm:$0xff]  ;;  %v160_v3 = vld [vmem:[#allocation10 + $0x18] sm:$0xff]  ;;  %v157_v9 = vld [vmem:[#allocation10] sm:$0xff]  ;;  %vm165_vm2 = vcmask 261120   ;;  %s441_s13 = smov [#allocation13]   ;;  %s227_s17 = sshll.u32 %s526_s8, 4  ;;  %s228_s17 = int_to_ptr.hbm [resolvable:$true] %s227_s17 }
  0x1d   :  { %181 = vmatpush.msra.mxu1 %v160_v3  ;;  %v118_v4 = vld [vmem:[#allocation2] sm:$0xff]  ;;  %v159_v7 = vld [vmem:[#allocation10 + $0x10] sm:$0xff]  ;;  %v158_v8 = vld [vmem:[#allocation10 + $0x8] sm:$0xff]  ;;  %s225_s14 = sshll.u32 %s441_s13, 4  ;;  %s226_s14 = int_to_ptr.vmem [resolvable:$true] %s225_s14 }
  0x1e   :  { %151 = vmatpush.msra.mxu0 %v126_v2  ;;  %v252_v10 = vld [vmem:[#allocation8] ss:$0 sm:$0xff]  ;;  %v191_v14 = vld [vmem:[#allocation11 + $0x8] sm:$0xff]  ;;  %v190_v15 = vld [vmem:[#allocation11] sm:$0xff] }
  0x1f   :  { %182 = vmatpush.msra.mxu1 %v159_v7  ;;  %213 = vmatpush.msra.mxu2 %v191_v14  ;;  %v253_v16 = vld [vmem:[%s523_s5] ss:$0 sm:$0xff] }
  0x20   :  { %v254_v20 = vld [vmem:[%s525_s7] ss:$0 sm:$0xff] }
  0x21   :  { %183 = vmatpush.msra.mxu1 %v158_v8  ;;  %214 = vmatpush.msra.mxu2 %v190_v15 }
  0x23   :  { %184 = vmatpush.msra.mxu1 %v157_v9 }
  0x8e   :  { %v122_v5 = vpop.permute.xlu0 %121 }
  0x8f   :  { %v125_v6 = vsel %vm124_vm0, %v118_v4, %v122_v5 }
  0x90   :  { %240 = vmatmul.msk.f32.vlgmr.msra.gmra.mxu0 %vm132_vm1, %v125_v6 }
 0x10d   :  { %v153_v11 = vpop.f32.mrf.mxu0 }
 0x10e   :  { %v154_v12 = vadd.f32 %v252_v10, %v153_v11 }
 0x110   :  { %v156_v13 = vmax.f32 %v154_v12, 0.0 }
 0x112   :  { %241 = vmatmul.msk.f32.vlgmr.msra.gmra.mxu1 %vm165_vm2, %v156_v13 }
 0x18f   :  { %v186_v17 = vpop.f32.mrf.mxu1 }
 0x190   :  { %v187_v18 = vadd.f32 %v253_v16, %v186_v17 }
 0x192   :  { %v189_v19 = vmax.f32 %v187_v18, 0.0 }
 0x194   :  { %242 = vmatmul.msk.f32.vlgmr.msra.gmra.mxu2 %vm132_vm1, %v189_v19 }
 0x217   :  { %v216_v21 = vpop.f32.mrf.mxu2 }
 0x218   :  { %v217_v22 = vadd.f32 %v254_v20, %v216_v21 }
 0x21a   :  { %219 = vst.msk [vmem:[#allocation13] sm:$0xff] %vm124_vm0, %v217_v22 }
 0x21b   :  { %230 = dma.vmem_to_hbm [thread:$0]  %s226_s14, 128, %s228_s17, [#allocation4]  }
 0x21c   :  { %431 = dma.done.wait [#allocation4], 128  }
 0x21d   :  { %432 = vsyncadd [#allocation4], 4294967168 }
 0x21e   :  { %235 = vsyncpa [#allocation3], 1 }
 0x21f   :  { %236 = vsyncpa [#allocation6], 1 }
 0x220   :  { %237 = vsyncpa [#allocation9], 1 }
 0x221   :  { %238 = vsyncpa [#allocation12], 1 }
 0x222   :  { %239 = vsyncpa [#allocation4], 1 }

</bundles_post_ra>
